<compile_context>
chip_gen: v6e
topology: v6e:2x2x1
jax: 0.10.0
libtpu: 0.0.40
codegen_flags: <defaults>
</compile_context>

<pallas_src>
import numpy as np
import jax
import jax.numpy as jnp
from jax import lax
from jax.experimental import pallas as pl
from jax.experimental.pallas import tpu as pltpu

GN_GROUPS = 16      # GroupNorm(16, C)
GN_EPS = 1e-5       # torch GroupNorm default eps
WS_EPS = 1e-12      # weight-standardization eps in the custom Conv3d


# --------------------------------------------------------------------------
# tiny host/XLA-side parameter & index preparation
# --------------------------------------------------------------------------

def _standardize_weight(w2d):
    """Weight standardization of the custom Conv3d (1x1x1 kernels).

    w2d: (Cout, Cin) == torch weight (Cout, Cin, 1, 1, 1) squeezed.
    torch.var default is unbiased (ddof=1), matching the PyTorch module.
    """
    m = jnp.mean(w2d, axis=1, keepdims=True)
    wc = w2d - m
    std = jnp.sqrt(jnp.var(wc, axis=1, ddof=1) + WS_EPS)[:, None]
    return wc / std


def _interp_matrix_1d(out_size, in_size):
    """1-D linear-interp matrix matching F.interpolate(align_corners=False)."""
    scale = in_size / out_size
    dst = np.arange(out_size, dtype=np.float64)
    src = np.maximum((dst + 0.5) * scale - 0.5, 0.0)   # PyTorch clamps src >= 0
    i0 = np.minimum(np.floor(src).astype(np.int64), in_size - 1)
    i1 = np.minimum(i0 + 1, in_size - 1)
    lam = src - i0
    M = np.zeros((out_size, in_size), dtype=np.float32)
    M[np.arange(out_size), i0] += (1.0 - lam)
    M[np.arange(out_size), i1] += lam
    return M


def _gn_fold(x_ncs, gamma, beta):
    """GroupNorm(16) stats over (group-channels x spatial), folded with the
    affine params into per-(n, c) scale/shift so the kernel applies
    y = x * scale + shift.  Centered variance (no cancellation)."""
    N, C, S = x_ncs.shape
    cg = C // GN_GROUPS
    xg = x_ncs.reshape(N, GN_GROUPS, cg * S)
    mean = jnp.mean(xg, axis=-1)                                   # (N, G)
    var = jnp.mean(jnp.square(xg - mean[..., None]), axis=-1)      # (N, G) biased
    inv = lax.rsqrt(var + GN_EPS)
    mean_c = jnp.repeat(mean, cg, axis=1)                          # (N, C)
    inv_c = jnp.repeat(inv, cg, axis=1)
    scale = inv_c * gamma[None, :]
    shift = beta[None, :] - mean_c * scale
    return scale[..., None], shift[..., None]                      # (N, C, 1)


def _pick_tile(total, cap):
    """Largest spatial tile that divides `total`: `total` itself if it fits
    under `cap`, otherwise the largest 128-multiple divisor <= cap."""
    if total <= cap:
        return total
    for cand in range(cap - cap % 128, 0, -128):
        if total % cand == 0:
            return cand
    return total   # fallback: single block (typical UNet shapes never hit this)


# --------------------------------------------------------------------------
# Pallas kernels
# --------------------------------------------------------------------------

def _gate_logits_kernel(xls_ref, g_ref, sx_ref, bx_ref, sg_ref, bg_ref,
                        wx_ref, wg_ref, dw_ref, db_ref, sig_ref):
    """Coarse (half-resolution) stage, pointwise over a spatial tile:
       GN-apply + ReLU, WS 1x1x1 convs (Wx stride-2 path & Wg), add+ReLU,
       per-sample dynamic 1x1x1 conv, sigmoid."""
    # GroupNorm folded as scale/shift (per-sample (C,1) blocks); VPU math f32.
    x_n = jnp.maximum(xls_ref[0] * sx_ref[0] + bx_ref[0], 0.0)       # (Fl, T2)
    g_n = jnp.maximum(g_ref[0] * sg_ref[0] + bg_ref[0], 0.0)         # (Fg, T2)

    # Weight-standardized 1x1x1 convs: bf16 MXU operands, f32 accumulation.
    xp = jnp.dot(wx_ref[...], x_n.astype(jnp.bfloat16),
                 preferred_element_type=jnp.float32)                 # (Fint, T2)
    gp = jnp.dot(wg_ref[...], g_n.astype(jnp.bfloat16),
                 preferred_element_type=jnp.float32)                 # (Fint, T2)
    feat = jnp.maximum(xp + gp, 0.0)

    # Dynamic per-instance conv (grouped conv, groups = N) -> scalar map.
    logits = jnp.dot(dw_ref[0], feat,
                     preferred_element_type=jnp.float32)             # (1, T2)
    logits = logits + db_ref[0]                                      # + (1, 1)

    # exp lives on the EUP; the divide is negligible at coarse resolution.
    sig_ref[0] = 1.0 / (1.0 + jnp.exp(-logits))


def _gate_apply_kernel(xl_ref, att_ref, wout_ref, out_ref):
    """Fine (full-resolution) stage: out = WSConv1x1(attention * xl)."""
    gated = (xl_ref[0] * att_ref[0]).astype(jnp.bfloat16)            # (Fl, T)
    out_ref[0] = jnp.dot(wout_ref[...], gated,
                         preferred_element_type=jnp.float32)         # (Fl, T)


# --------------------------------------------------------------------------
# wrapper
# --------------------------------------------------------------------------

def dyn_attention_gate(xl, g, dyn_w, dyn_b, params,
                       *, spatial_tile=16384, coarse_tile=8192):
    """xl: (N, Fl, D, H, W); g: (N, Fg, ceil(D/2), ceil(H/2), ceil(W/2));
       dyn_w: (N, Fint, 1, 1, 1); dyn_b: (N,)."""
    N, Fl, D, H, W = xl.shape
    _, Fg, D2, H2, W2 = g.shape
    Fint = params["wx"].shape[0]
    S, S2 = D * H * W, D2 * H2 * W2
    assert Fl % GN_GROUPS == 0 and Fg % GN_GROUPS == 0

    # ---- NCDHW -> (N, C, S): pure reshape, no transposes / HBM shuffles.
    xl_f = xl.reshape(N, Fl, S)
    g_f = g.reshape(N, Fg, S2)
    # Conv stride 2 with k=1,p=0 == subsample then 1x1x1 matmul.
    xl_sub = xl[:, :, ::2, ::2, ::2].reshape(N, Fl, S2)
    assert xl_sub.shape == (N, Fl, S2)

    # ---- GroupNorm stats: cheap standalone reduction folded with the affine.
    sx, bx = _gn_fold(xl_f, params["gx_gamma"], params["gx_beta"])   # (N, Fl, 1)
    sg, bg = _gn_fold(g_f, params["gg_gamma"], params["gg_beta"])    # (N, Fg, 1)

    # ---- weight standardization; bf16 copies for the MXU (f32 accumulation).
    wx = _standardize_weight(params["wx"]).astype(jnp.bfloat16)      # (Fint, Fl)
    wg = _standardize_weight(params["wg"]).astype(jnp.bfloat16)      # (Fint, Fg)
    wout = _standardize_weight(params["wout"]).astype(jnp.bfloat16)  # (Fl, Fl)

    dw = dyn_w.reshape(N, 1, Fint).astype(jnp.float32)               # per-sample blocks
    db = dyn_b.reshape(N, 1, 1).astype(jnp.float32)

    compiler_params = pltpu.CompilerParams(
        dimension_semantics=("parallel", "parallel"),
        vmem_limit_bytes=32 * 1024 * 1024)

    # ---- coarse kernel: everything at half resolution -> sigmoid gate map.
    T2 = _pick_tile(S2, coarse_tile)
    sig = pl.pallas_call(
        _gate_logits_kernel,
        out_shape=jax.ShapeDtypeStruct((N, 1, S2), jnp.float32),
        grid=(N, S2 // T2),
        in_specs=[
            pl.BlockSpec((1, Fl, T2), lambda n, s: (n, 0, s)),   # xl_sub
            pl.BlockSpec((1, Fg, T2), lambda n, s: (n, 0, s)),   # g
            pl.BlockSpec((1, Fl, 1), lambda n, s: (n, 0, 0)),    # GN scale (xl)
            pl.BlockSpec((1, Fl, 1), lambda n, s: (n, 0, 0)),    # GN shift (xl)
            pl.BlockSpec((1, Fg, 1), lambda n, s: (n, 0, 0)),    # GN scale (g)
            pl.BlockSpec((1, Fg, 1), lambda n, s: (n, 0, 0)),    # GN shift (g)
            pl.BlockSpec((Fint, Fl), lambda n, s: (0, 0)),       # wx (bf16)
            pl.BlockSpec((Fint, Fg), lambda n, s: (0, 0)),       # wg (bf16)
            pl.BlockSpec((1, 1, Fint), lambda n, s: (n, 0, 0)),  # dyn weight
            pl.BlockSpec((1, 1, 1), lambda n, s: (n, 0, 0)),     # dyn bias
        ],
        out_specs=pl.BlockSpec((1, 1, T2), lambda n, s: (n, 0, s)),
        compiler_params=compiler_params,
    )(xl_sub, g_f, sx, bx, sg, bg, wx, wg, dw, db)

    # ---- trilinear x2 upsample of the tiny sigmoid map: three separable
    #      matmuls (replaces the dense (S, S2) Kronecker matrix of the old
    #      version).  Touches only S floats/sample -> negligible traffic.
    Md = jnp.asarray(_interp_matrix_1d(D, D2))
    Mh = jnp.asarray(_interp_matrix_1d(H, H2))
    Mw = jnp.asarray(_interp_matrix_1d(W, W2))
    sig4 = sig.reshape(N, D2, H2, W2)
    up = jnp.einsum('Dd,ndhw->nDhw', Md, sig4)
    up = jnp.einsum('Hh,ndhw->ndHw', Mh, up)
    up = jnp.einsum('Ww,ndhw->ndhW', Mw, up)
    att = up.reshape(N, 1, S)

    # ---- fine kernel: out = WSConv1x1(attention * xl), tiled over (N, S).
    T = _pick_tile(S, spatial_tile)
    out_f = pl.pallas_call(
        _gate_apply_kernel,
        out_shape=jax.ShapeDtypeStruct((N, Fl, S), jnp.float32),
        grid=(N, S // T),
        in_specs=[
            pl.BlockSpec((1, Fl, T), lambda n, s: (n, 0, s)),    # xl
            pl.BlockSpec((1, 1, T), lambda n, s: (n, 0, s)),     # attention
            pl.BlockSpec((Fl, Fl), lambda n, s: (0, 0)),         # wout (bf16)
        ],
        out_specs=pl.BlockSpec((1, Fl, T), lambda n, s: (n, 0, s)),
        compiler_params=compiler_params,
    )(xl_f, att, wout)

    # (N, Fl, S) -> NCDHW (pure reshape).
    return out_f.reshape(N, Fl, D, H, W)


# --------------------------------------------------------------------------
# pure-JAX reference (for validation); matmul_dtype lets us validate against
# both the exact f32 math and the kernel's bf16-input / f32-accumulate policy.
# --------------------------------------------------------------------------

def reference_forward(xl, g, dyn_w, dyn_b, params, matmul_dtype=jnp.float32):
    N, Fl, D, H, W = xl.shape
    _, Fg, D2, H2, W2 = g.shape

    def gn_relu(x, gamma, beta):
        n, c = x.shape[0], x.shape[1]
        xr = x.reshape(n, GN_GROUPS, c // GN_GROUPS, -1)
        mean = xr.mean(axis=(2, 3), keepdims=True)
        var = ((xr - mean) ** 2).mean(axis=(2, 3), keepdims=True)
        xn = ((xr - mean) / jnp.sqrt(var + GN_EPS)).reshape(x.shape)
        xn = xn * gamma[None, :, None, None, None] + beta[None, :, None, None, None]
        return jnp.maximum(xn, 0.0)

    def conv1x1(x, w):   # x: (N,C,D,H,W), w: (O,C) standardized
        return jnp.einsum('ncdhw,oc->nodhw',
                          x.astype(matmul_dtype), w.astype(matmul_dtype),
                          preferred_element_type=jnp.float32)

    wx = _standardize_weight(params["wx"])
    wg = _standardize_weight(params["wg"])
    wout = _standardize_weight(params["wout"])

    xl_n = gn_relu(xl, params["gx_gamma"], params["gx_beta"])[:, :, ::2, ::2, ::2]
    xl_p = conv1x1(xl_n, wx)
    g_n = gn_relu(g, params["gg_gamma"], params["gg_beta"])
    g_p = conv1x1(g_n, wg)
    feat = jnp.maximum(xl_p + g_p, 0.0)
    logits = jnp.einsum('ncdhw,nc->ndhw', feat, dyn_w.reshape(N, -1)) \
             + dyn_b[:, None, None, None]
    sig = jax.nn.sigmoid(logits)
    Md = jnp.asarray(_interp_matrix_1d(D, D2))
    Mh = jnp.asarray(_interp_matrix_1d(H, H2))
    Mw = jnp.asarray(_interp_matrix_1d(W, W2))
    up = jnp.einsum('Dd,ndhw->nDhw', Md, sig)
    up = jnp.einsum('Hh,ndhw->ndHw', Mh, up)
    up = jnp.einsum('Ww,ndhw->ndhW', Mw, up)
    att = up[:, None]
    return conv1x1(att * xl, wout)


# --------------------------------------------------------------------------
# main
# --------------------------------------------------------------------------

if __name__ == "__main__":
    N, Fl, Fg, Fint = 2, 32, 32, 16          # Fl, Fg divisible by 16 (GroupNorm)
    D = H = W = 8

    key = jax.random.PRNGKey(0)
    ks = jax.random.split(key, 10)
    xl = jax.random.normal(ks[0], (N, Fl, D, H, W), jnp.float32)
    g = jax.random.normal(ks[1], (N, Fg, D // 2, H // 2, W // 2), jnp.float32)
    dyn_w = 0.5 * jax.random.normal(ks[2], (N, Fint, 1, 1, 1), jnp.float32)
    dyn_b = 0.1 * jax.random.normal(ks[3], (N,), jnp.float32)

    params = dict(
        wx=0.1 * jax.random.normal(ks[4], (Fint, Fl), jnp.float32),
        wg=0.1 * jax.random.normal(ks[5], (Fint, Fg), jnp.float32),
        wout=0.1 * jax.random.normal(ks[6], (Fl, Fl), jnp.float32),
        gx_gamma=1.0 + 0.1 * jax.random.normal(ks[7], (Fl,), jnp.float32),
        gx_beta=0.1 * jax.random.normal(ks[8], (Fl,), jnp.float32),
        gg_gamma=jnp.ones((Fg,), jnp.float32),
        gg_beta=jnp.zeros((Fg,), jnp.float32),
    )

    fwd = jax.jit(dyn_attention_gate)
    out = jax.block_until_ready(fwd(xl, g, dyn_w, dyn_b, params))
    assert out.shape == (N, Fl, D, H, W)

    # (1) Tight elementwise check against a reference using the same
    #     mixed-precision matmul policy (bf16 MXU inputs, f32 accumulation).
    ref_mixed = reference_forward(xl, g, dyn_w, dyn_b, params,
                                  matmul_dtype=jnp.bfloat16)
    np.testing.assert_allclose(np.asarray(out), np.asarray(ref_mixed),
                               rtol=1e-2, atol=1e-2)

    # (2) Sanity check against the exact f32 reference: bf16 MXU inputs keep
    #     the relative L2 error of the whole forward well below 1%.
    ref_f32 = reference_forward(xl, g, dyn_w, dyn_b, params,
                                matmul_dtype=jnp.float32)
    err = np.linalg.norm(np.asarray(out) - np.asarray(ref_f32))
    nrm = np.linalg.norm(np.asarray(ref_f32))
    assert err / nrm < 2e-2, ("relative L2 error vs f32 reference", err / nrm)

    print("KERNEL_OK")
</pallas_src>

<mosaic_0001>
module attributes {stable_mosaic.version = 11 : i64} {
  func.func @_gate_logits_kernel(%arg0: i32, %arg1: i32, %arg2: memref<1x32x64xf32, #tpu.memory_space<vmem>>, %arg3: memref<1x32x64xf32, #tpu.memory_space<vmem>>, %arg4: memref<1x32x1xf32, #tpu.memory_space<vmem>>, %arg5: memref<1x32x1xf32, #tpu.memory_space<vmem>>, %arg6: memref<1x32x1xf32, #tpu.memory_space<vmem>>, %arg7: memref<1x32x1xf32, #tpu.memory_space<vmem>>, %arg8: memref<16x32xbf16, #tpu.memory_space<vmem>>, %arg9: memref<16x32xbf16, #tpu.memory_space<vmem>>, %arg10: memref<1x1x16xf32, #tpu.memory_space<vmem>>, %arg11: memref<1x1x1xf32, #tpu.memory_space<vmem>>, %arg12: memref<1x1x64xf32, #tpu.memory_space<vmem>>) attributes {dimension_semantics = [#tpu.dimension_semantics<parallel>, #tpu.dimension_semantics<parallel>], iteration_bounds = array<i64: 2, 1>, scalar_prefetch = 0 : i64, scratch_operands = 0 : i64, tpu.core_type = #tpu.core_type<tc>, window_params = [{transform_indices = @transform_0, window_bounds = array<i64: 1, 32, 64>}, {transform_indices = @transform_1, window_bounds = array<i64: 1, 32, 64>}, {transform_indices = @transform_2, window_bounds = array<i64: 1, 32, 1>}, {transform_indices = @transform_3, window_bounds = array<i64: 1, 32, 1>}, {transform_indices = @transform_4, window_bounds = array<i64: 1, 32, 1>}, {transform_indices = @transform_5, window_bounds = array<i64: 1, 32, 1>}, {pipeline_mode = #tpu.pipeline_mode<synchronous>, transform_indices = @transform_6, window_bounds = array<i64: 16, 32>}, {pipeline_mode = #tpu.pipeline_mode<synchronous>, transform_indices = @transform_7, window_bounds = array<i64: 16, 32>}, {transform_indices = @transform_8, window_bounds = array<i64: 1, 1, 16>}, {transform_indices = @transform_9, window_bounds = array<i64: 1, 1, 1>}, {transform_indices = @transform_10, window_bounds = array<i64: 1, 1, 64>}]} {
    %c0 = arith.constant 0 : index
    %c0_0 = arith.constant 0 : index
    %c0_1 = arith.constant 0 : index
    %0 = vector.load %arg2[%c0, %c0_0, %c0_1] : memref<1x32x64xf32, #tpu.memory_space<vmem>>, vector<1x32x64xf32>
    %1 = vector.shape_cast %0 : vector<1x32x64xf32> to vector<32x64xf32>
    %c0_2 = arith.constant 0 : index
    %c0_3 = arith.constant 0 : index
    %c0_4 = arith.constant 0 : index
    %2 = vector.load %arg4[%c0_2, %c0_3, %c0_4] : memref<1x32x1xf32, #tpu.memory_space<vmem>>, vector<1x32x1xf32>
    %3 = vector.shape_cast %2 : vector<1x32x1xf32> to vector<32x1xf32>
    %4 = vector.broadcast %3 : vector<32x1xf32> to vector<32x64xf32>
    %5 = arith.mulf %1, %4 : vector<32x64xf32>
    %c0_5 = arith.constant 0 : index
    %c0_6 = arith.constant 0 : index
    %c0_7 = arith.constant 0 : index
    %6 = vector.load %arg5[%c0_5, %c0_6, %c0_7] : memref<1x32x1xf32, #tpu.memory_space<vmem>>, vector<1x32x1xf32>
    %7 = vector.shape_cast %6 : vector<1x32x1xf32> to vector<32x1xf32>
    %8 = vector.broadcast %7 : vector<32x1xf32> to vector<32x64xf32>
    %9 = arith.addf %5, %8 : vector<32x64xf32>
    %cst = arith.constant 0.000000e+00 : f32
    %10 = vector.broadcast %cst : f32 to vector<32x64xf32>
    %11 = arith.maximumf %9, %10 : vector<32x64xf32>
    %c0_8 = arith.constant 0 : index
    %c0_9 = arith.constant 0 : index
    %c0_10 = arith.constant 0 : index
    %12 = vector.load %arg3[%c0_8, %c0_9, %c0_10] : memref<1x32x64xf32, #tpu.memory_space<vmem>>, vector<1x32x64xf32>
    %13 = vector.shape_cast %12 : vector<1x32x64xf32> to vector<32x64xf32>
    %c0_11 = arith.constant 0 : index
    %c0_12 = arith.constant 0 : index
    %c0_13 = arith.constant 0 : index
    %14 = vector.load %arg6[%c0_11, %c0_12, %c0_13] : memref<1x32x1xf32, #tpu.memory_space<vmem>>, vector<1x32x1xf32>
    %15 = vector.shape_cast %14 : vector<1x32x1xf32> to vector<32x1xf32>
    %16 = vector.broadcast %15 : vector<32x1xf32> to vector<32x64xf32>
    %17 = arith.mulf %13, %16 : vector<32x64xf32>
    %c0_14 = arith.constant 0 : index
    %c0_15 = arith.constant 0 : index
    %c0_16 = arith.constant 0 : index
    %18 = vector.load %arg7[%c0_14, %c0_15, %c0_16] : memref<1x32x1xf32, #tpu.memory_space<vmem>>, vector<1x32x1xf32>
    %19 = vector.shape_cast %18 : vector<1x32x1xf32> to vector<32x1xf32>
    %20 = vector.broadcast %19 : vector<32x1xf32> to vector<32x64xf32>
    %21 = arith.addf %17, %20 : vector<32x64xf32>
    %cst_17 = arith.constant 0.000000e+00 : f32
    %22 = vector.broadcast %cst_17 : f32 to vector<32x64xf32>
    %23 = arith.maximumf %21, %22 : vector<32x64xf32>
    %c0_18 = arith.constant 0 : index
    %c0_19 = arith.constant 0 : index
    %24 = vector.load %arg8[%c0_18, %c0_19] : memref<16x32xbf16, #tpu.memory_space<vmem>>, vector<16x32xbf16>
    %25 = arith.truncf %11 : vector<32x64xf32> to vector<32x64xbf16>
    %cst_20 = arith.constant dense<0.000000e+00> : vector<16x64xf32>
    %26 = tpu.matmul %24, %25, %cst_20 {dimension_numbers = #tpu.dot_dimension_numbers<[1], [0], [0], [1], [0, 0, 1, 1], [], []>} : vector<16x32xbf16>, vector<32x64xbf16>, vector<16x64xf32> -> vector<16x64xf32>
    %c0_21 = arith.constant 0 : index
    %c0_22 = arith.constant 0 : index
    %27 = vector.load %arg9[%c0_21, %c0_22] : memref<16x32xbf16, #tpu.memory_space<vmem>>, vector<16x32xbf16>
    %28 = arith.truncf %23 : vector<32x64xf32> to vector<32x64xbf16>
    %cst_23 = arith.constant dense<0.000000e+00> : vector<16x64xf32>
    %29 = tpu.matmul %27, %28, %cst_23 {dimension_numbers = #tpu.dot_dimension_numbers<[1], [0], [0], [1], [0, 0, 1, 1], [], []>} : vector<16x32xbf16>, vector<32x64xbf16>, vector<16x64xf32> -> vector<16x64xf32>
    %30 = arith.addf %26, %29 : vector<16x64xf32>
    %cst_24 = arith.constant 0.000000e+00 : f32
    %31 = vector.broadcast %cst_24 : f32 to vector<16x64xf32>
    %32 = arith.maximumf %30, %31 : vector<16x64xf32>
    %c0_25 = arith.constant 0 : index
    %c0_26 = arith.constant 0 : index
    %c0_27 = arith.constant 0 : index
    %33 = vector.load %arg10[%c0_25, %c0_26, %c0_27] : memref<1x1x16xf32, #tpu.memory_space<vmem>>, vector<1x1x16xf32>
    %34 = vector.shape_cast %33 : vector<1x1x16xf32> to vector<1x16xf32>
    %cst_28 = arith.constant dense<0.000000e+00> : vector<1x64xf32>
    %35 = tpu.matmul %34, %32, %cst_28 {dimension_numbers = #tpu.dot_dimension_numbers<[1], [0], [0], [1], [0, 0, 1, 1], [], []>} : vector<1x16xf32>, vector<16x64xf32>, vector<1x64xf32> -> vector<1x64xf32>
    %c0_29 = arith.constant 0 : index
    %c0_30 = arith.constant 0 : index
    %c0_31 = arith.constant 0 : index
    %36 = vector.load %arg11[%c0_29, %c0_30, %c0_31] : memref<1x1x1xf32, #tpu.memory_space<vmem>>, vector<1x1x1xf32>
    %37 = vector.shape_cast %36 : vector<1x1x1xf32> to vector<1x1xf32>
    %38 = vector.broadcast %37 : vector<1x1xf32> to vector<1x64xf32>
    %39 = arith.addf %35, %38 : vector<1x64xf32>
    %cst_32 = arith.constant 0.000000e+00 : f32
    %40 = vector.broadcast %cst_32 : f32 to vector<1x64xf32>
    %41 = arith.subf %40, %39 : vector<1x64xf32>
    %42 = math.exp %41 : vector<1x64xf32>
    %cst_33 = arith.constant 1.000000e+00 : f32
    %43 = vector.broadcast %cst_33 : f32 to vector<1x64xf32>
    %44 = arith.addf %43, %42 : vector<1x64xf32>
    %cst_34 = arith.constant 1.000000e+00 : f32
    %45 = vector.broadcast %cst_34 : f32 to vector<1x64xf32>
    %46 = arith.divf %45, %44 : vector<1x64xf32>
    %c0_35 = arith.constant 0 : index
    %c0_36 = arith.constant 0 : index
    %c0_37 = arith.constant 0 : index
    %47 = vector.load %arg12[%c0_35, %c0_36, %c0_37] : memref<1x1x64xf32, #tpu.memory_space<vmem>>, vector<1x1x64xf32>
    %48 = vector.shape_cast %47 : vector<1x1x64xf32> to vector<1x64xf32>
    %49 = vector.shape_cast %46 : vector<1x64xf32> to vector<1x1x64xf32>
    tpu.vector_store %arg12[%c0_35, %c0_36, %c0_37], %49 {strides = array<i32>} : memref<1x1x64xf32, #tpu.memory_space<vmem>>, vector<1x1x64xf32>,
    return
  }
  func.func @transform_0(%arg0: i32, %arg1: i32) -> (i32, i32, i32) {
    %c0_i32 = arith.constant 0 : i32
    %c0_i32_0 = arith.constant 0 : i32
    return %arg0, %c0_i32, %arg1 : i32, i32, i32
  }
  func.func @transform_1(%arg0: i32, %arg1: i32) -> (i32, i32, i32) {
    %c0_i32 = arith.constant 0 : i32
    %c0_i32_0 = arith.constant 0 : i32
    return %arg0, %c0_i32, %arg1 : i32, i32, i32
  }
  func.func @transform_2(%arg0: i32, %arg1: i32) -> (i32, i32, i32) {
    %c0_i32 = arith.constant 0 : i32
    %c0_i32_0 = arith.constant 0 : i32
    %c0_i32_1 = arith.constant 0 : i32
    return %arg0, %c0_i32, %c0_i32_0 : i32, i32, i32
  }
  func.func @transform_3(%arg0: i32, %arg1: i32) -> (i32, i32, i32) {
    %c0_i32 = arith.constant 0 : i32
    %c0_i32_0 = arith.constant 0 : i32
    %c0_i32_1 = arith.constant 0 : i32
    return %arg0, %c0_i32, %c0_i32_0 : i32, i32, i32
  }
  func.func @transform_4(%arg0: i32, %arg1: i32) -> (i32, i32, i32) {
    %c0_i32 = arith.constant 0 : i32
    %c0_i32_0 = arith.constant 0 : i32
    %c0_i32_1 = arith.constant 0 : i32
    return %arg0, %c0_i32, %c0_i32_0 : i32, i32, i32
  }
  func.func @transform_5(%arg0: i32, %arg1: i32) -> (i32, i32, i32) {
    %c0_i32 = arith.constant 0 : i32
    %c0_i32_0 = arith.constant 0 : i32
    %c0_i32_1 = arith.constant 0 : i32
    return %arg0, %c0_i32, %c0_i32_0 : i32, i32, i32
  }
  func.func @transform_6(%arg0: i32, %arg1: i32) -> (i32, i32) {
    %c0_i32 = arith.constant 0 : i32
    %c0_i32_0 = arith.constant 0 : i32
    %c0_i32_1 = arith.constant 0 : i32
    return %c0_i32, %c0_i32_0 : i32, i32
  }
  func.func @transform_7(%arg0: i32, %arg1: i32) -> (i32, i32) {
    %c0_i32 = arith.constant 0 : i32
    %c0_i32_0 = arith.constant 0 : i32
    %c0_i32_1 = arith.constant 0 : i32
    return %c0_i32, %c0_i32_0 : i32, i32
  }
  func.func @transform_8(%arg0: i32, %arg1: i32) -> (i32, i32, i32) {
    %c0_i32 = arith.constant 0 : i32
    %c0_i32_0 = arith.constant 0 : i32
    %c0_i32_1 = arith.constant 0 : i32
    return %arg0, %c0_i32, %c0_i32_0 : i32, i32, i32
  }
  func.func @transform_9(%arg0: i32, %arg1: i32) -> (i32, i32, i32) {
    %c0_i32 = arith.constant 0 : i32
    %c0_i32_0 = arith.constant 0 : i32
    %c0_i32_1 = arith.constant 0 : i32
    return %arg0, %c0_i32, %c0_i32_0 : i32, i32, i32
  }
  func.func @transform_10(%arg0: i32, %arg1: i32) -> (i32, i32, i32) {
    %c0_i32 = arith.constant 0 : i32
    %c0_i32_0 = arith.constant 0 : i32
    return %arg0, %c0_i32, %arg1 : i32, i32, i32
  }
}

module attributes {stable_mosaic.version = 11 : i64} {
  func.func @_gate_apply_kernel(%arg0: i32, %arg1: i32, %arg2: memref<1x32x512xf32, #tpu.memory_space<vmem>>, %arg3: memref<1x1x512xf32, #tpu.memory_space<vmem>>, %arg4: memref<32x32xbf16, #tpu.memory_space<vmem>>, %arg5: memref<1x32x512xf32, #tpu.memory_space<vmem>>) attributes {dimension_semantics = [#tpu.dimension_semantics<parallel>, #tpu.dimension_semantics<parallel>], iteration_bounds = array<i64: 2, 1>, scalar_prefetch = 0 : i64, scratch_operands = 0 : i64, tpu.core_type = #tpu.core_type<tc>, window_params = [{transform_indices = @transform_0, window_bounds = array<i64: 1, 32, 512>}, {transform_indices = @transform_1, window_bounds = array<i64: 1, 1, 512>}, {pipeline_mode = #tpu.pipeline_mode<synchronous>, transform_indices = @transform_2, window_bounds = array<i64: 32, 32>}, {transform_indices = @transform_3, window_bounds = array<i64: 1, 32, 512>}]} {
    %c0 = arith.constant 0 : index
    %c0_0 = arith.constant 0 : index
    %c0_1 = arith.constant 0 : index
    %0 = vector.load %arg2[%c0, %c0_0, %c0_1] : memref<1x32x512xf32, #tpu.memory_space<vmem>>, vector<1x32x512xf32>
    %1 = vector.shape_cast %0 : vector<1x32x512xf32> to vector<32x512xf32>
    %c0_2 = arith.constant 0 : index
    %c0_3 = arith.constant 0 : index
    %c0_4 = arith.constant 0 : index
    %2 = vector.load %arg3[%c0_2, %c0_3, %c0_4] : memref<1x1x512xf32, #tpu.memory_space<vmem>>, vector<1x1x512xf32>
    %3 = vector.shape_cast %2 : vector<1x1x512xf32> to vector<1x512xf32>
    %4 = vector.broadcast %3 : vector<1x512xf32> to vector<32x512xf32>
    %5 = arith.mulf %1, %4 : vector<32x512xf32>
    %6 = arith.truncf %5 : vector<32x512xf32> to vector<32x512xbf16>
    %c0_5 = arith.constant 0 : index
    %c0_6 = arith.constant 0 : index
    %7 = vector.load %arg4[%c0_5, %c0_6] : memref<32x32xbf16, #tpu.memory_space<vmem>>, vector<32x32xbf16>
    %cst = arith.constant dense<0.000000e+00> : vector<32x512xf32>
    %8 = tpu.matmul %7, %6, %cst {dimension_numbers = #tpu.dot_dimension_numbers<[1], [0], [0], [1], [0, 0, 1, 1], [], []>} : vector<32x32xbf16>, vector<32x512xbf16>, vector<32x512xf32> -> vector<32x512xf32>
    %c0_7 = arith.constant 0 : index
    %c0_8 = arith.constant 0 : index
    %c0_9 = arith.constant 0 : index
    %9 = vector.load %arg5[%c0_7, %c0_8, %c0_9] : memref<1x32x512xf32, #tpu.memory_space<vmem>>, vector<1x32x512xf32>
    %10 = vector.shape_cast %9 : vector<1x32x512xf32> to vector<32x512xf32>
    %11 = vector.shape_cast %8 : vector<32x512xf32> to vector<1x32x512xf32>
    tpu.vector_store %arg5[%c0_7, %c0_8, %c0_9], %11 {strides = array<i32>} : memref<1x32x512xf32, #tpu.memory_space<vmem>>, vector<1x32x512xf32>,
    return
  }
  func.func @transform_0(%arg0: i32, %arg1: i32) -> (i32, i32, i32) {
    %c0_i32 = arith.constant 0 : i32
    %c0_i32_0 = arith.constant 0 : i32
    return %arg0, %c0_i32, %arg1 : i32, i32, i32
  }
  func.func @transform_1(%arg0: i32, %arg1: i32) -> (i32, i32, i32) {
    %c0_i32 = arith.constant 0 : i32
    %c0_i32_0 = arith.constant 0 : i32
    return %arg0, %c0_i32, %arg1 : i32, i32, i32
  }
  func.func @transform_2(%arg0: i32, %arg1: i32) -> (i32, i32) {
    %c0_i32 = arith.constant 0 : i32
    %c0_i32_0 = arith.constant 0 : i32
    %c0_i32_1 = arith.constant 0 : i32
    return %c0_i32, %c0_i32_0 : i32, i32
  }
  func.func @transform_3(%arg0: i32, %arg1: i32) -> (i32, i32, i32) {
    %c0_i32 = arith.constant 0 : i32
    %c0_i32_0 = arith.constant 0 : i32
    return %arg0, %c0_i32, %arg1 : i32, i32, i32
  }
}

</mosaic_0001>

<bundles_post_ra>
// kernel: dyn_attention_gate.2
= control target key start
LH: loop header
LB: loop body
LE: loop exit
PB: predicated region body
PF: predicated region fallthrough
CT: control target
= control target key end

     0   :  { %s1191_s13 = smov 0   ;;  %s1193_s14 = smov 0   ;;  %s1289_s0 = inlined_call_operand.vmem [shape: f32[2,32,64], index: 0, kind: input, shape index: {}]   ;;  %s1290_s1 = inlined_call_operand.vmem [shape: f32[2,32,64], index: 1, kind: input, shape index: {}]   ;;  %s1291_s2 = inlined_call_operand.vmem [shape: f32[2,32,1], index: 2, kind: input, shape index: {}]   ;;  %s1292_s3 = inlined_call_operand.vmem [shape: f32[2,32,1], index: 3, kind: input, shape index: {}]   ;;  %s1293_s4 = inlined_call_operand.vmem [shape: f32[2,32,1], index: 4, kind: input, shape index: {}]   ;;  %s1294_s5 = inlined_call_operand.vmem [shape: f32[2,32,1], index: 5, kind: input, shape index: {}]   ;;  %s1295_s6 = inlined_call_operand.vmem [shape: bf16[16,32], index: 6, kind: input, shape index: {}]   ;;  %s1296_s7 = inlined_call_operand.vmem [shape: bf16[16,32], index: 7, kind: input, shape index: {}]   ;;  %s1297_s8 = inlined_call_operand.vmem [shape: f32[2,1,16], index: 8, kind: input, shape index: {}]   ;;  %s1298_s9 = inlined_call_operand.vmem [shape: f32[2,1,1], index: 9, kind: input, shape index: {}]   ;;  %s1299_s10 = inlined_call_operand.vmem [shape: f32[2,1,64], index: 10, kind: output, shape index: {}]  }
   0x1   :  { %s1195_s15 = smov 0  }
   0x2 LB: > { %s32_s16 = sadd.s32 1, %s1127_s14  ;;  %p1016_p0 = scmp.ge.s32.totalorder %s1131_s15, 1  ;;  %s1131_s15 = sphi %s1195_s15, %s20_s15   ;;  %s1127_s14 = sphi %s1193_s14, %s1301_s14   ;;  %s1123_s13 = sphi %s1191_s13, %s1300_s13  }
   0x3   : > { %p34_p1 = scmp.ge.s32.totalorder %s32_s16, 2  ;;  %p402_p2 = scmp.lt.s32.totalorder %s1131_s15, 3 }
   0x5   : > { %s1303_s16 = smov (%p34_p1, %s32_s16), 0  ;;  %p403_p3 = pnand %p1016_p0, %p402_p2 }
   0x6   : > { %p478_p4 = scmp.lt.s32.totalorder (!%p403_p3), %s1123_s13, 1 }
   0x7   : > { %406 = sbr.rel (%p403_p3) target bundleno = 612 (0x264), region = 60 }
   0xc   : > { %v1133_v0 = vmov 0   ;;  %s1305_s13 = smov (!%p478_p4, %s1123_s13), 1  ;;  %v1134_v9 = vmov 0.0   ;;  %vm1135_vm0 = vmmov 0   ;;  %vm668_vm1 = vcmask 261120  }
   0xd   : > { %1102 = vset.pattern.permute.xlu1 %v1133_v0  ;;  %1101 = vset.pattern.permute.xlu0 %v1133_v0  ;;  %s1212_s17 = sshll.u32 %s1305_s13, 5  ;;  %s519_s12 = scalar_lea.vmem %s1298_s9, %s1305_s13  ;;  %vm775_vm2 = vcmask 130048   ;;  %vm855_vm3 = vcmask 516096  }
   0xe   : > { %s508_s20 = scalar_lea.vmem %s1293_s4, %s1212_s17  ;;  %s498_s23 = scalar_lea.vmem %s1291_s2, %s1212_s17  ;;  %1059 = vmatprep.subr.bf16.mxu1 %v1134_v9  ;;  %1051 = vmatprep.subr.bf16.mxu0 %v1134_v9  ;;  %v765_v18 = vld [vmem:[%s519_s12] sm:$0x1] }
   0xf   : > { %v597_v1 = vld [vmem:[%s508_s20 + $0x10] sm:$0xff]  ;;  %v598_v3 = vld [vmem:[%s508_s20 + $0x18] sm:$0xff]  ;;  %s503_s26 = scalar_lea.vmem %s1292_s3, %s1212_s17  ;;  %s513_s29 = scalar_lea.vmem %s1294_s5, %s1212_s17  ;;  %v532_v10 = vld [vmem:[%s498_s23 + $0x8] sm:$0xff]  ;;  %1063 = vmatprep.mubr.msk.bf16.mxu1 %vm1135_vm0, %v1134_v9  ;;  %1055 = vmatprep.mubr.msk.bf16.mxu0 %vm1135_vm0, %v1134_v9 }
  0x10   : > { %v533_v2 = vld [vmem:[%s498_s23 + $0x10] sm:$0xff]  ;;  %611 = vperm.xlu1 %1102, %v597_v1   ;;  %v534_v4 = vld [vmem:[%s498_s23 + $0x18] sm:$0xff]  ;;  %v531_v11 = vld [vmem:[%s498_s23] sm:$0xff]  ;;  %s1252_s23 = scalar_lea.vmem %s1290_s1, %s1212_s17  ;;  %s525_s12 = scalar_lea.vmem %s1299_s10, %s1305_s13 }
  0x11   : > { %547 = vperm.xlu0 %1101, %v533_v2   ;;  %v562_v5 = vld [vmem:[%s503_s26 + $0x18] sm:$0xff]  ;;  %v561_v6 = vld [vmem:[%s503_s26 + $0x10] sm:$0xff]  ;;  %v596_v12 = vld [vmem:[%s508_s20 + $0x8] sm:$0xff] }
  0x12   : > { %v626_v7 = vld [vmem:[%s513_s29 + $0x18] sm:$0xff]  ;;  %v625_v8 = vld [vmem:[%s513_s29 + $0x10] sm:$0xff]  ;;  %v595_v13 = vld [vmem:[%s508_s20] sm:$0xff]  ;;  %s1244_s20 = scalar_lea.vmem %s1289_s0, %s1212_s17 }
  0x13   : > { %v560_v14 = vld [vmem:[%s503_s26 + $0x8] sm:$0xff]  ;;  %v559_v15 = vld [vmem:[%s503_s26] sm:$0xff]  ;;  %v529_v21 = vld [vmem:[%s1244_s20 + $0x10] sm:$0xff] }
  0x14   : > { %616 = vperm.xlu1 %1102, %v598_v3   ;;  %v624_v16 = vld [vmem:[%s513_s29 + $0x8] sm:$0xff]  ;;  %v623_v17 = vld [vmem:[%s513_s29] sm:$0xff]  ;;  %v530_v24 = vld [vmem:[%s1244_s20 + $0x18] sm:$0xff]  ;;  %s516_s29 = scalar_lea.vmem %s1297_s8, %s1305_s13 }
  0x15   : > { %552 = vperm.xlu0 %1101, %v534_v4   ;;  %v593_v27 = vld [vmem:[%s1252_s23 + $0x10] sm:$0xff]  ;;  %v594_v28 = vld [vmem:[%s1252_s23 + $0x18] sm:$0xff]  ;;  %v528_v47 = vld [vmem:[%s1244_s20 + $0x8] sm:$0xff] }
  0x16   : > { %v527_v48 = vld [vmem:[%s1244_s20] sm:$0xff]  ;;  %v592_v53 = vld [vmem:[%s1252_s23 + $0x8] sm:$0xff] }
  0x17   : > { %v591_v54 = vld [vmem:[%s1252_s23] sm:$0xff] }
  0x18   : > { %580 = vperm.xlu1 %1102, %v562_v5   ;;  %v1103_v4 = vld [vmem:[%s1295_s6] sm:$0xff]  }
  0x19   : > { %575 = vperm.xlu0 %1101, %v561_v6  }
  0x1c   : > { %644 = vperm.xlu1 %1102, %v626_v7  }
  0x1d   : > { %639 = vperm.xlu0 %1101, %v625_v8   ;;  %v1104_v8 = vld [vmem:[%s1296_s7] sm:$0xff]  }
  0x20   : > { %542 = vperm.xlu1 %1102, %v532_v10  }
  0x21   : > { %537 = vperm.xlu0 %1101, %v531_v11  }
  0x24   : > { %606 = vperm.xlu1 %1102, %v596_v12  }
  0x25   : > { %601 = vperm.xlu0 %1101, %v595_v13  }
  0x28   : > { %570 = vperm.xlu1 %1102, %v560_v14  }
  0x29   : > { %565 = vperm.xlu0 %1101, %v559_v15  }
  0x2c   : > { %634 = vperm.xlu1 %1102, %v624_v16  }
  0x2d   : > { %629 = vperm.xlu0 %1101, %v623_v17  }
  0x31   : > { %768 = vperm.xlu0 %1101, %v765_v18  }
  0x8b   : > { %v612_v19 = vpop.permute.xlu1 %611 }
  0x8c   : > { %v548_v20 = vpop.permute.xlu0 %547  ;;  %v621_v33 = vmul.f32 %v612_v19, %v593_v27 }
  0x8d   : > { %v557_v25 = vmul.f32 %v548_v20, %v529_v21 }
  0x8f   : > { %v617_v22 = vpop.permute.xlu1 %616 }
  0x90   : > { %v553_v23 = vpop.permute.xlu0 %552  ;;  %v622_v34 = vmul.f32 %v617_v22, %v594_v28  ;;  %v764_v22 = vld [vmem:[%s516_s29] sm:$0x1] }
  0x91   : > { %v558_v26 = vmul.f32 %v553_v23, %v530_v24  ;;  %v771_v23 = vlaneseq }
  0x93   : > { %v581_v29 = vpop.permute.xlu1 %580  ;;  %v772_v24 = vshrl.u32 %v771_v23, 7 }
  0x94   : > { %v576_v30 = vpop.permute.xlu0 %575  ;;  %v586_v31 = vadd.f32 %v581_v29, %v558_v26 }
  0x95   : > { %v585_v32 = vadd.f32 %v576_v30, %v557_v25  ;;  %v773_v25 = vsub.s32 0, %v772_v24 }
  0x96   : > { %v590_v35 = vmax.f32 %v586_v31, 0.0 }
  0x97   : > { %v589_v36 = vmax.f32 %v585_v32, 0.0  ;;  %v645_v37 = vpop.permute.xlu1 %644 }
  0x98   : > { %v640_v38 = vpop.permute.xlu0 %639  ;;  %v650_v39 = vadd.f32 %v645_v37, %v622_v34 }
  0x99   : > { %v649_v40 = vadd.f32 %v640_v38, %v621_v33  ;;  %v658_v41 = vpack.c.bf16 %v590_v35, %v589_v36 }
  0x9a   : > { %v654_v42 = vmax.f32 %v650_v39, 0.0 }
  0x9b   : > { %v653_v43 = vmax.f32 %v649_v40, 0.0  ;;  %1060 = vmatpush3.bf16.msra.mxu1 %v658_v41  ;;  %v543_v44 = vpop.permute.xlu1 %542 }
  0x9c   : > { %v538_v45 = vpop.permute.xlu0 %537  ;;  %1061 = vmatprep.subr.bf16.mxu1 %v1134_v9  ;;  %v556_v51 = vmul.f32 %v543_v44, %v528_v47 }
  0x9d   : > { %v662_v46 = vpack.c.bf16 %v654_v42, %v653_v43  ;;  %v555_v52 = vmul.f32 %v538_v45, %v527_v48 }
  0x9f   : > { %1052 = vmatpush3.bf16.msra.mxu0 %v662_v46  ;;  %v607_v49 = vpop.permute.xlu1 %606 }
  0xa0   : > { %v602_v50 = vpop.permute.xlu0 %601  ;;  %1053 = vmatprep.subr.bf16.mxu0 %v1134_v9  ;;  %v620_v59 = vmul.f32 %v607_v49, %v592_v53 }
  0xa1   : > { %v619_v60 = vmul.f32 %v602_v50, %v591_v54 }
  0xa3   : > { %v571_v55 = vpop.permute.xlu1 %570 }
  0xa4   : > { %v566_v56 = vpop.permute.xlu0 %565  ;;  %v584_v57 = vadd.f32 %v571_v55, %v556_v51 }
  0xa5   : > { %v583_v58 = vadd.f32 %v566_v56, %v555_v52 }
  0xa6   : > { %v588_v61 = vmax.f32 %v584_v57, 0.0 }
  0xa7   : > { %v587_v62 = vmax.f32 %v583_v58, 0.0  ;;  %v635_v63 = vpop.permute.xlu1 %634 }
  0xa8   : > { %v630_v0 = vpop.permute.xlu0 %629  ;;  %v648_v2 = vadd.f32 %v635_v63, %v620_v59 }
  0xa9   : > { %v657_v1 = vpack.c.bf16 %v588_v61, %v587_v62  ;;  %v647_v3 = vadd.f32 %v630_v0, %v619_v60 }
  0xaa   : > { %v652_v5 = vmax.f32 %v648_v2, 0.0 }
  0xab   : > { %v651_v6 = vmax.f32 %v647_v3, 0.0  ;;  %1062 = vmatpush3.bf16.msra.mxu1 %v657_v1 }
  0xac   : > { %v769_v26 = vpop.permute.xlu0 %768 }
  0xad   : > { %v661_v7 = vpack.c.bf16 %v652_v5, %v651_v6  ;;  %v774_v27 = vrot.slane %v769_v26, %v773_v25 }
  0xae   : > { %1064 = vmatmul.mubr.msk.bf16.vlgmr.msra.gmra.mxu1 %vm668_vm1, %v1103_v4 }
  0xaf   : > { %1054 = vmatpush3.bf16.msra.mxu0 %v661_v7 }
  0xb0   : > { %1067 = vmatprep.subr.mxu0 %v1134_v9 }
  0xb2   : > { %1056 = vmatmul.mubr.msk.bf16.vlgmr.msra.gmra.mxu0 %vm668_vm1, %v1104_v8 }
  0xb3   : > { %1071 = vmatprep.mubr.msk.f32.mxu0 %vm1135_vm0, %v1134_v9 }
 0x16e   : > { %v755_v10 = vpop.f32.mrf.mxu1 }
 0x170   : > { %v1065_v11 = vpop.f32.mrf.mxu1 }
 0x172   : > { %v706_v12 = vpop.f32.mrf.mxu0  ;;  %v758_v13 = vpop.f32.mrf.mxu1 }
 0x173   : > { %v756_v17 = vadd.f32 %v755_v10, %v706_v12 }
 0x174   : > { %v1057_v14 = vpop.f32.mrf.mxu0  ;;  %v1066_v15 = vpop.f32.mrf.mxu1 }
 0x175   : > { %v762_v21 = vmax.f32 %v756_v17, 0.0 }
 0x176   : > { %v709_v16 = vpop.f32.mrf.mxu0 }
 0x177   : > { %v759_v18 = vadd.f32 %v758_v13, %v709_v16 }
 0x178   : > { %v1058_v19 = vpop.f32.mrf.mxu0 }
 0x179   : > { %v763_v20 = vmax.f32 %v759_v18, 0.0 }
 0x17b   : > { %1068 = vmatpush3.msra.mxu0 %v763_v20 }
 0x17c   : > { %1069 = vmatprep.subr.mxu0 %v1134_v9 }
 0x17d   : > { %1070 = vmatpush3.msra.mxu0 %v762_v21 }
 0x17e   : > { %1072 = vmatmul.mubr.msk.f32.vlgmr.msra.gmra.mxu0 %vm775_vm2, %v764_v22 }
 0x23e   : > { %v845_v28 = vpop.f32.mrf.mxu0 }
 0x23f   : > { %v846_v29 = vadd.f32 %v845_v28, %v774_v27 }
 0x240   : > { %v1073_v30 = vpop.f32.mrf.mxu0 }
 0x241   : > { %v849_v31 = vsub.f32 0.0, %v846_v29 }
 0x243   : > { %v850_v32 = vmul.f32 1.442695, %v849_v31 }
 0x245   : > { %1105 = vpow2.f32 %v850_v32 }
 0x252   : > { %v1106_v33 = vpop.eup %1105 }
 0x253   : > { %v852_v34 = vadd.f32 1.0, %v1106_v33 }
 0x255   : > { %1107 = vrcp.f32 %v852_v34 }
 0x262   : > { %v1108_v9 = vpop.eup %1107 }
 0x263   : > { %856 = vst.msk [vmem:[%s525_s12] sm:$0x1] %vm855_vm3, %v1108_v9 }
 0x264 PF: > { %s20_s15 = sadd.s32 1, %s1131_s15   ;;  %s1300_s13 = smov %s1127_s14 }
 0x265   : > { %p17_p5 = scmp.ge.s32.totalorder %s20_s15, 4   ;;  %s1301_s14 = smov %s1303_s16 }
 0x267   :  { %19 = sbr.rel (!%p17_p5) target bundleno = 2 (0x2), region = 111 }

// kernel: dyn_attention_gate.3
= control target key start
LH: loop header
LB: loop body
LE: loop exit
PB: predicated region body
PF: predicated region fallthrough
CT: control target
= control target key end

     0   :  { %s643_s12 = smov 0   ;;  %s645_s13 = smov 0   ;;  %s733_s0 = inlined_call_operand.vmem [shape: f32[2,32,512], index: 0, kind: input, shape index: {}]   ;;  %s734_s1 = inlined_call_operand.vmem [shape: f32[2,1,512], index: 1, kind: input, shape index: {}]   ;;  %s735_s2 = inlined_call_operand.vmem [shape: bf16[32,32], index: 2, kind: input, shape index: {}]   ;;  %s736_s3 = inlined_call_operand.vmem [shape: f32[2,32,512], index: 3, kind: output, shape index: {}]  }
   0x1   :  { %s647_s14 = smov 0  }
   0x2 LB: > { %s25_s15 = sadd.s32 1, %s616_s13  ;;  %p555_p0 = scmp.ge.s32.totalorder %s620_s14, 1  ;;  %s620_s14 = sphi %s647_s14, %s13_s14   ;;  %s616_s13 = sphi %s645_s13, %s738_s13   ;;  %s612_s12 = sphi %s643_s12, %s737_s12  }
   0x3   : > { %p27_p1 = scmp.ge.s32.totalorder %s25_s15, 2  ;;  %p174_p2 = scmp.lt.s32.totalorder %s620_s14, 3 }
   0x5   : > { %s740_s15 = smov (%p27_p1, %s25_s15), 0  ;;  %p175_p3 = pnand %p555_p0, %p174_p2 }
   0x6   : > { %p215_p4 = scmp.lt.s32.totalorder (!%p175_p3), %s612_s12, 1 }
   0x7   : > { %178 = sbr.rel (%p175_p3) target bundleno = 240 (0xf0), region = 32 }
   0xc   : > { %v262_v0 = vlaneseq  ;;  %v622_v1 = vmov 0   ;;  %s742_s12 = smov (!%p215_p4, %s612_s12), 1  ;;  %v596_v52 = vld [vmem:[%s735_s2] sm:$0xff]   ;;  %vm320_vm0 = vcmask 261120   ;;  %v597_v53 = vld [vmem:[%s735_s2 + $0x8] sm:$0xff]  }
   0xd   : > { %359 = vmatprep.mubr.bf16.mxu0 %v622_v1  ;;  %412 = vmatprep.mubr.bf16.mxu1 %v622_v1  ;;  %s569_s16 = sshll.u32 %s742_s12, 7  ;;  %s558_s17 = sshll.u32 %s742_s12, 2 }
   0xe   : > { %v263_v2 = vshrl.u32 %v262_v0, 7  ;;  %s672_s20 = scalar_lea.vmem %s733_s0, %s569_s16  ;;  %s231_s23 = scalar_lea.vmem %s734_s1, %s558_s17 }
   0xf   : > { %v253_v7 = vld [vmem:[%s672_s20 + $0x48] sm:$0xff]  ;;  %v260_v9 = vld [vmem:[%s231_s23] sm:$0xf]  ;;  %v255_v11 = vld [vmem:[%s672_s20 + $0x58] sm:$0xff]  ;;  %s706_s30 = scalar_lea.vmem %s736_s3, %s569_s16 }
  0x10   : > { %v268_v3 = vsub.s32 1, %v263_v2  ;;  %v276_v4 = vsub.s32 3, %v263_v2  ;;  %v264_v5 = vsub.s32 0, %v263_v2  ;;  %v272_v6 = vsub.s32 2, %v263_v2  ;;  %v257_v8 = vld [vmem:[%s672_s20 + $0x68] sm:$0xff]  ;;  %v259_v12 = vld [vmem:[%s672_s20 + $0x78] sm:$0xff] }
  0x11   : > { %v252_v14 = vld [vmem:[%s672_s20 + $0x40] sm:$0xff]  ;;  %v254_v18 = vld [vmem:[%s672_s20 + $0x50] sm:$0xff]  ;;  %v245_v24 = vld [vmem:[%s672_s20 + $0x8] sm:$0xff] }
  0x12   : > { %v269_v10 = vrot.slane %v260_v9, %v268_v3  ;;  %v277_v13 = vrot.slane %v260_v9, %v276_v4  ;;  %v265_v15 = vrot.slane %v260_v9, %v264_v5  ;;  %v273_v16 = vrot.slane %v260_v9, %v272_v6  ;;  %v256_v17 = vld [vmem:[%s672_s20 + $0x60] sm:$0xff]  ;;  %v258_v19 = vld [vmem:[%s672_s20 + $0x70] sm:$0xff]  ;;  %v249_v25 = vld [vmem:[%s672_s20 + $0x28] sm:$0xff] }
  0x13   : > { %v247_v26 = vld [vmem:[%s672_s20 + $0x18] sm:$0xff]  ;;  %v244_v32 = vld [vmem:[%s672_s20] sm:$0xff]  ;;  %v246_v38 = vld [vmem:[%s672_s20 + $0x10] sm:$0xff] }
  0x14   : > { %v291_v20 = vmul.f32 %v269_v10, %v253_v7  ;;  %v295_v21 = vmul.f32 %v269_v10, %v257_v8  ;;  %v293_v22 = vmul.f32 %v277_v13, %v255_v11  ;;  %v297_v23 = vmul.f32 %v277_v13, %v259_v12  ;;  %v251_v31 = vld [vmem:[%s672_s20 + $0x38] sm:$0xff]  ;;  %v248_v33 = vld [vmem:[%s672_s20 + $0x20] sm:$0xff]  ;;  %v250_v39 = vld [vmem:[%s672_s20 + $0x30] sm:$0xff] }
  0x15   : > { %v290_v27 = vmul.f32 %v265_v15, %v252_v14  ;;  %v294_v28 = vmul.f32 %v265_v15, %v256_v17  ;;  %v292_v29 = vmul.f32 %v273_v16, %v254_v18  ;;  %v296_v30 = vmul.f32 %v273_v16, %v258_v19 }
  0x16   : > { %v303_v34 = vpack.c.bf16 %v295_v21, %v291_v20  ;;  %v305_v35 = vpack.c.bf16 %v297_v23, %v293_v22  ;;  %v283_v36 = vmul.f32 %v269_v10, %v245_v24  ;;  %v287_v37 = vmul.f32 %v269_v10, %v249_v25 }
  0x17   : > { %v302_v40 = vpack.c.bf16 %v294_v28, %v290_v27  ;;  %v304_v41 = vpack.c.bf16 %v296_v30, %v292_v29  ;;  %v285_v42 = vmul.f32 %v277_v13, %v247_v26  ;;  %v289_v43 = vmul.f32 %v277_v13, %v251_v31 }
  0x18   : > { %339 = vmatprep.subr.bf16.mxu0 %v303_v34  ;;  %392 = vmatprep.subr.bf16.mxu1 %v305_v35  ;;  %v299_v44 = vpack.c.bf16 %v287_v37, %v283_v36  ;;  %v282_v45 = vmul.f32 %v265_v15, %v244_v32  ;;  %v286_v46 = vmul.f32 %v265_v15, %v248_v33 }
  0x19   : > { %340 = vmatpush1.bf16.msra.mxu0 %v302_v40  ;;  %393 = vmatpush1.bf16.msra.mxu1 %v304_v41  ;;  %v301_v47 = vpack.c.bf16 %v289_v43, %v285_v42  ;;  %v284_v48 = vmul.f32 %v273_v16, %v246_v38  ;;  %v288_v49 = vmul.f32 %v273_v16, %v250_v39 }
  0x1a   : > { %341 = vmatprep.subr.bf16.mxu0 %v299_v44  ;;  %v298_v50 = vpack.c.bf16 %v286_v46, %v282_v45 }
  0x1b   : > { %394 = vmatprep.subr.bf16.mxu1 %v301_v47  ;;  %v300_v51 = vpack.c.bf16 %v288_v49, %v284_v48 }
  0x1d   : > { %342 = vmatpush1.bf16.msra.mxu0 %v298_v50  ;;  %395 = vmatpush1.bf16.msra.mxu1 %v300_v51 }
  0x20   : > { %563 = vmatmul.mubr.msk.bf16.vlgmr.msra.gmra.mxu0 %vm320_vm0, %v596_v52  ;;  %565 = vmatmul.mubr.msk.bf16.vlgmr.msra.gmra.mxu1 %vm320_vm0, %v596_v52 }
  0x21   : > { %369 = vmatprep.mubr.bf16.mxu0 %v622_v1  ;;  %422 = vmatprep.mubr.bf16.mxu1 %v622_v1 }
  0x28   : > { %564 = vmatmul.mubr.msk.bf16.gmra.mxu0 %vm320_vm0, %v597_v53  ;;  %566 = vmatmul.mubr.msk.bf16.gmra.mxu1 %vm320_vm0, %v597_v53 }
  0xe0   : > { %v361_v54 = vpop.f32.mrf.mxu0  ;;  %v414_v55 = vpop.f32.mrf.mxu1 }
  0xe1   : > { %433 = vst [vmem:[%s706_s30] sm:$0xff] %v361_v54  ;;  %435 = vst [vmem:[%s706_s30 + $0x10] sm:$0xff] %v414_v55 }
  0xe2   : > { %v363_v56 = vpop.f32.mrf.mxu0  ;;  %v416_v57 = vpop.f32.mrf.mxu1 }
  0xe3   : > { %434 = vst [vmem:[%s706_s30 + $0x8] sm:$0xff] %v363_v56  ;;  %436 = vst [vmem:[%s706_s30 + $0x18] sm:$0xff] %v416_v57 }
  0xe4   : > { %v365_v58 = vpop.f32.mrf.mxu0  ;;  %v418_v59 = vpop.f32.mrf.mxu1 }
  0xe5   : > { %437 = vst [vmem:[%s706_s30 + $0x20] sm:$0xff] %v365_v58  ;;  %439 = vst [vmem:[%s706_s30 + $0x30] sm:$0xff] %v418_v59 }
  0xe6   : > { %v367_v60 = vpop.f32.mrf.mxu0  ;;  %v420_v61 = vpop.f32.mrf.mxu1 }
  0xe7   : > { %438 = vst [vmem:[%s706_s30 + $0x28] sm:$0xff] %v367_v60  ;;  %440 = vst [vmem:[%s706_s30 + $0x38] sm:$0xff] %v420_v61 }
  0xe8   : > { %v371_v62 = vpop.f32.mrf.mxu0  ;;  %v424_v63 = vpop.f32.mrf.mxu1 }
  0xe9   : > { %441 = vst [vmem:[%s706_s30 + $0x40] sm:$0xff] %v371_v62  ;;  %443 = vst [vmem:[%s706_s30 + $0x50] sm:$0xff] %v424_v63 }
  0xea   : > { %v373_v0 = vpop.f32.mrf.mxu0  ;;  %v426_v1 = vpop.f32.mrf.mxu1 }
  0xeb   : > { %442 = vst [vmem:[%s706_s30 + $0x48] sm:$0xff] %v373_v0  ;;  %444 = vst [vmem:[%s706_s30 + $0x58] sm:$0xff] %v426_v1 }
  0xec   : > { %v375_v2 = vpop.f32.mrf.mxu0  ;;  %v428_v3 = vpop.f32.mrf.mxu1 }
  0xed   : > { %445 = vst [vmem:[%s706_s30 + $0x60] sm:$0xff] %v375_v2  ;;  %447 = vst [vmem:[%s706_s30 + $0x70] sm:$0xff] %v428_v3 }
  0xee   : > { %v377_v4 = vpop.f32.mrf.mxu0  ;;  %v430_v5 = vpop.f32.mrf.mxu1 }
  0xef   : > { %446 = vst [vmem:[%s706_s30 + $0x68] sm:$0xff] %v377_v4  ;;  %448 = vst [vmem:[%s706_s30 + $0x78] sm:$0xff] %v430_v5 }
  0xf0 PF: > { %s13_s14 = sadd.s32 1, %s620_s14   ;;  %s737_s12 = smov %s616_s13 }
  0xf1   : > { %p10_p5 = scmp.ge.s32.totalorder %s13_s14, 4   ;;  %s738_s13 = smov %s740_s15 }
  0xf3   :  { %12 = sbr.rel (!%p10_p5) target bundleno = 2 (0x2), region = 65 }

</bundles_post_ra>
